<compile_context>
chip_gen: v7x
topology: tpu7x:2x2x1
jax: 0.10.0
libtpu: 0.0.40
codegen_flags: <defaults>
</compile_context>

<pallas_src>
import functools

import jax
import jax.numpy as jnp
from jax.experimental import pallas as pl
from jax.experimental.pallas import tpu as pltpu

EPS = 1e-8          # matches nn.BatchNorm1d(num_features, eps=1e-08)
NEG_SLOPE = 0.01    # nn.LeakyReLU default negative_slope


def _round_up(x, m):
    return (x + m - 1) // m * m


# ---------------------------------------------------------------------------
# Fused kernel: phase 0 = batch statistics (Gram form), phase 1 = apply.
# ---------------------------------------------------------------------------
def _fused_kernel(x_ref, w_ref, gamma_ref, beta_ref, o_ref,
                  sumx_ref, gram_ref, scale_ref, shift_ref,
                  *, n_rows, tile, inv_n):
    p = pl.program_id(0)   # 0: statistics phase, 1: normalize+activate phase
    i = pl.program_id(1)   # row-tile index

    @pl.when(jnp.logical_and(p == 0, i == 0))
    def _init():
        sumx_ref[...] = jnp.zeros_like(sumx_ref)
        gram_ref[...] = jnp.zeros_like(gram_ref)

    @pl.when(p == 0)
    def _stats():
        x = x_ref[...]
        # Mask rows beyond n_rows in the (possibly ragged) last tile: garbage rows
        # must not perturb the sums (select, not multiply, to be NaN-safe).
        row = jax.lax.broadcasted_iota(jnp.int32, (tile, 1), 0) + i * tile
        xm = jnp.where(row < n_rows, x, jnp.zeros_like(x))
        # Row sums (tiny, (tile, in_dim)) accumulated into row 0 of an 8-row
        # scratch so the finalize matmul has M=8 (no degenerate M=1 matmul).
        sumx_ref[0:1, :] += jnp.sum(xm.astype(jnp.float32), axis=0, keepdims=True)
        # Gram matrix x^T x on the MXU (contraction over the row axis).
        gram_ref[...] += jax.lax.dot_general(
            xm, xm, (((0,), (0,)), ((), ())),
            preferred_element_type=jnp.float32)

    @pl.when(jnp.logical_and(p == 0, i == pl.num_programs(1) - 1))
    def _finalize():
        w = w_ref[...].astype(jnp.float32)                       # (in_dim, out_dim)
        sums = jnp.dot(sumx_ref[...], w,
                       preferred_element_type=jnp.float32)       # (8, out_dim), rows 1..7 = 0
        mean = sums[0:1, :] * inv_n                               # (1, out_dim)
        gw = jnp.dot(gram_ref[...], w,
                     preferred_element_type=jnp.float32)          # (in_dim, out_dim)
        ex2 = jnp.sum(w * gw, axis=0, keepdims=True) * inv_n      # E[h^2], (1, out_dim)
        # Biased variance (PyTorch train-mode normalization), clamped vs. drift.
        var = jnp.maximum(ex2 - mean * mean, 0.0)
        scale = gamma_ref[...] * jax.lax.rsqrt(var + EPS)         # rsqrt -> EUP slot
        scale_ref[...] = scale
        shift_ref[...] = beta_ref[...] - mean * scale

    @pl.when(p == 1)
    def _apply():
        # Recompute the thin matmul (cheaper than writing + re-reading h).
        # Linear bias deliberately omitted: it cancels exactly in h - mean(h).
        h = jnp.dot(x_ref[...], w_ref[...], preferred_element_type=jnp.float32)
        y = h * scale_ref[...] + shift_ref[...]                   # one FMA per element
        o_ref[...] = jnp.maximum(y, NEG_SLOPE * y).astype(o_ref.dtype)


def linear_bn_lrelu(x, w_t, gamma, beta, *, tile_n=1024, matmul_dtype=None):
    """x: (N, in_dim); w_t: (in_dim, out_dim); gamma/beta: (1, out_dim) -> (N, out_dim) f32."""
    n, in_dim = x.shape
    out_dim = w_t.shape[1]
    gamma = gamma.reshape(1, out_dim).astype(jnp.float32)
    beta = beta.reshape(1, out_dim).astype(jnp.float32)

    if matmul_dtype is not None:     # e.g. jnp.bfloat16 when activations live in bf16
        x = x.astype(matmul_dtype)
        w_t = w_t.astype(matmul_dtype)

    # Row tile: multiple of 8 sublanes; no padding of x — the ragged last tile is
    # masked in-kernel (stats) and masked on writeback (output).
    tile = min(_round_up(tile_n, 8), _round_up(n, 8))
    n_tiles = pl.cdiv(n, tile)
    grid = (2, n_tiles)              # phase axis, row-tile axis

    x_spec = pl.BlockSpec((tile, in_dim), lambda p, i: (i, 0))
    w_spec = pl.BlockSpec((in_dim, out_dim), lambda p, i: (0, 0))    # VMEM-resident
    vec_spec = pl.BlockSpec((1, out_dim), lambda p, i: (0, 0))       # VMEM-resident
    # Phase 0 parks the output on block 0 (never written there); phase 1 writes
    # block i. The first writeback only happens after block 0 holds real data.
    out_spec = pl.BlockSpec((tile, out_dim), lambda p, i: (i * p, 0))

    kernel = functools.partial(_fused_kernel, n_rows=n, tile=tile, inv_n=1.0 / n)

    return pl.pallas_call(
        kernel,
        out_shape=jax.ShapeDtypeStruct((n, out_dim), jnp.float32),
        grid_spec=pltpu.PrefetchScalarGridSpec(
            num_scalar_prefetch=0,
            grid=grid,
            in_specs=[x_spec, w_spec, vec_spec, vec_spec],
            out_specs=out_spec,
            scratch_shapes=[pltpu.VMEM((8, in_dim), jnp.float32),        # sum(x) in row 0
                            pltpu.VMEM((in_dim, in_dim), jnp.float32),   # Gram x^T x
                            pltpu.VMEM((1, out_dim), jnp.float32),       # scale
                            pltpu.VMEM((1, out_dim), jnp.float32)]),     # shift
        compiler_params=pltpu.CompilerParams(
            # Both axes carry state (stats accumulate; apply reads the finalized
            # scale/shift scratch) -> "arbitrary".
            dimension_semantics=("arbitrary", "arbitrary")),
    )(x, w_t, gamma, beta)


class ResNetEmbeddingParams:
    """Deterministic synthetic parameters matching the PyTorch module shapes."""

    def __init__(self, node_input_dim, edge_input_dim, out_dim, key):
        k1, k2, k3, k4 = jax.random.split(key, 4)
        # nn.Linear weight is (out_dim, in_dim); store the transpose for x @ W^T.
        self.node_w_t = (jax.random.normal(k1, (node_input_dim, out_dim), jnp.float32)
                         * (1.0 / jnp.sqrt(node_input_dim)))
        self.node_b = jax.random.normal(k2, (1, out_dim), jnp.float32) * 0.1
        self.edge_w_t = (jax.random.normal(k3, (edge_input_dim, out_dim), jnp.float32)
                         * (1.0 / jnp.sqrt(edge_input_dim)))
        self.edge_b = jax.random.normal(k4, (1, out_dim), jnp.float32) * 0.1
        # BatchNorm1d affine params at init: gamma=1, beta=0.
        self.node_gamma = jnp.ones((1, out_dim), jnp.float32)
        self.node_beta = jnp.zeros((1, out_dim), jnp.float32)
        self.edge_gamma = jnp.ones((1, out_dim), jnp.float32)
        self.edge_beta = jnp.zeros((1, out_dim), jnp.float32)


def resnet_embedding_forward(params, node_feature, edge_feature):
    # Linear bias cancels under training-mode BatchNorm, so it is not passed in.
    node_out = linear_bn_lrelu(node_feature, params.node_w_t,
                               params.node_gamma, params.node_beta)
    edge_out = linear_bn_lrelu(edge_feature, params.edge_w_t,
                               params.edge_gamma, params.edge_beta)
    return node_out, edge_out


if __name__ == "__main__":
    key = jax.random.PRNGKey(0)
    k_params, k_node, k_edge = jax.random.split(key, 3)

    node_input_dim = 16
    edge_input_dim = 8
    out_dim = 32
    num_nodes = 8
    num_edges = 16

    params = ResNetEmbeddingParams(node_input_dim, edge_input_dim, out_dim, k_params)
    node_feature = jax.random.normal(k_node, (num_nodes, node_input_dim), jnp.float32)
    edge_feature = jax.random.normal(k_edge, (num_edges, edge_input_dim), jnp.float32)

    node_out, edge_out = resnet_embedding_forward(params, node_feature, edge_feature)
    jax.block_until_ready((node_out, edge_out))

    # Pure-JAX reference (includes the Linear bias, demonstrating its exact cancellation).
    def ref(x, w_t, b, g, bt):
        h = x @ w_t + b
        m = h.mean(0, keepdims=True)
        v = ((h - m) ** 2).mean(0, keepdims=True)
        y = (h - m) / jnp.sqrt(v + EPS) * g + bt
        return jnp.where(y >= 0, y, NEG_SLOPE * y)

    ref_node = ref(node_feature, params.node_w_t, params.node_b,
                   params.node_gamma, params.node_beta)
    ref_edge = ref(edge_feature, params.edge_w_t, params.edge_b,
                   params.edge_gamma, params.edge_beta)
    assert jnp.allclose(node_out, ref_node, atol=1e-3, rtol=1e-3)
    assert jnp.allclose(edge_out, ref_edge, atol=1e-3, rtol=1e-3)

    # bf16-operand path (for callers whose activations/weights already live in bf16).
    edge_out_bf16 = linear_bn_lrelu(edge_feature, params.edge_w_t,
                                    params.edge_gamma, params.edge_beta,
                                    matmul_dtype=jnp.bfloat16)
    jax.block_until_ready(edge_out_bf16)
    assert jnp.allclose(edge_out_bf16, ref_edge, atol=1e-1, rtol=1e-1)

    print("KERNEL_OK")
</pallas_src>

<mosaic_0001>
module attributes {stable_mosaic.version = 11 : i64} {
  func.func @_fused_kernel(%arg0: i32, %arg1: i32, %arg2: memref<8x16xf32, #tpu.memory_space<vmem>>, %arg3: memref<16x32xf32, #tpu.memory_space<vmem>>, %arg4: memref<1x32xf32, #tpu.memory_space<vmem>>, %arg5: memref<1x32xf32, #tpu.memory_space<vmem>>, %arg6: memref<8x32xf32, #tpu.memory_space<vmem>>, %arg7: memref<8x16xf32, #tpu.memory_space<vmem>>, %arg8: memref<16x16xf32, #tpu.memory_space<vmem>>, %arg9: memref<1x32xf32, #tpu.memory_space<vmem>>, %arg10: memref<1x32xf32, #tpu.memory_space<vmem>>) attributes {dimension_semantics = [#tpu.dimension_semantics<arbitrary>, #tpu.dimension_semantics<arbitrary>], iteration_bounds = array<i64: 2, 1>, scalar_prefetch = 0 : i64, scratch_operands = 4 : i64, tpu.core_type = #tpu.core_type<tc>, window_params = [{transform_indices = @transform_0, window_bounds = array<i64: 8, 16>}, {pipeline_mode = #tpu.pipeline_mode<synchronous>, transform_indices = @transform_1, window_bounds = array<i64: 16, 32>}, {pipeline_mode = #tpu.pipeline_mode<synchronous>, transform_indices = @transform_2, window_bounds = array<i64: 1, 32>}, {pipeline_mode = #tpu.pipeline_mode<synchronous>, transform_indices = @transform_3, window_bounds = array<i64: 1, 32>}, {transform_indices = @transform_4, window_bounds = array<i64: 8, 32>}]} {
    %c0_i32 = arith.constant 0 : i32
    %0 = arith.cmpi eq, %arg0, %c0_i32 : i32
    %c0_i32_0 = arith.constant 0 : i32
    %1 = arith.cmpi eq, %arg1, %c0_i32_0 : i32
    %2 = arith.andi %0, %1 : i1
    %3 = arith.extui %2 : i1 to i32
    %c0_i32_1 = arith.constant 0 : i32
    %4 = arith.cmpi ne, %3, %c0_i32_1 : i32
    scf.if %4 {
      %cst = arith.constant 0.000000e+00 : f32
      %16 = vector.broadcast %cst : f32 to vector<8x16xf32>
      %c0 = arith.constant 0 : index
      %c0_8 = arith.constant 0 : index
      %17 = vector.load %arg7[%c0, %c0_8] : memref<8x16xf32, #tpu.memory_space<vmem>>, vector<8x16xf32>
      tpu.vector_store %arg7[%c0, %c0_8], %16 {strides = array<i32>} : memref<8x16xf32, #tpu.memory_space<vmem>>, vector<8x16xf32>,
      %cst_9 = arith.constant 0.000000e+00 : f32
      %18 = vector.broadcast %cst_9 : f32 to vector<16x16xf32>
      %c0_10 = arith.constant 0 : index
      %c0_11 = arith.constant 0 : index
      %19 = vector.load %arg8[%c0_10, %c0_11] : memref<16x16xf32, #tpu.memory_space<vmem>>, vector<16x16xf32>
      tpu.vector_store %arg8[%c0_10, %c0_11], %18 {strides = array<i32>} : memref<16x16xf32, #tpu.memory_space<vmem>>, vector<16x16xf32>,
    } else {
    }
    %c0_i32_2 = arith.constant 0 : i32
    %5 = arith.cmpi eq, %arg0, %c0_i32_2 : i32
    %6 = arith.extui %5 : i1 to i32
    %c0_i32_3 = arith.constant 0 : i32
    %7 = arith.cmpi ne, %6, %c0_i32_3 : i32
    scf.if %7 {
      %c0 = arith.constant 0 : index
      %c0_8 = arith.constant 0 : index
      %16 = vector.load %arg2[%c0, %c0_8] : memref<8x16xf32, #tpu.memory_space<vmem>>, vector<8x16xf32>
      %17 = tpu.iota {dimensions = array<i32: 0>} : vector<8x1xi32>
      %c8_i32 = arith.constant 8 : i32
      %18 = arith.muli %arg1, %c8_i32 : i32
      %19 = vector.broadcast %18 : i32 to vector<8x1xi32>
      %20 = arith.addi %17, %19 : vector<8x1xi32>
      %c8_i32_9 = arith.constant 8 : i32
      %21 = vector.broadcast %c8_i32_9 : i32 to vector<8x1xi32>
      %22 = arith.cmpi slt, %20, %21 : vector<8x1xi32>
      %cst = arith.constant 0.000000e+00 : f32
      %23 = vector.broadcast %cst : f32 to vector<8x16xf32>
      %24 = vector.shape_cast %22 : vector<8x1xi1> to vector<8x1xi1>
      %25 = vector.broadcast %24 : vector<8x1xi1> to vector<8x16xi1>
      %26 = arith.select %25, %16, %23 : vector<8x16xi1>, vector<8x16xf32>
      %c0_10 = arith.constant 0 : index
      %c0_11 = arith.constant 0 : index
      %27 = vector.load %arg7[%c0_10, %c0_11] : memref<8x16xf32, #tpu.memory_space<vmem>>, vector<1x16xf32>
      %cst_12 = arith.constant dense<0.000000e+00> : vector<16xf32>
      %28 = vector.multi_reduction <add>, %26, %cst_12 [0] : vector<8x16xf32> to vector<16xf32>
      %29 = vector.shape_cast %28 : vector<16xf32> to vector<1x16xf32>
      %30 = arith.addf %27, %29 : vector<1x16xf32>
      %c0_13 = arith.constant 0 : index
      %c0_14 = arith.constant 0 : index
      %31 = vector.load %arg7[%c0_13, %c0_14] : memref<8x16xf32, #tpu.memory_space<vmem>>, vector<1x16xf32>
      tpu.vector_store %arg7[%c0_13, %c0_14], %30 {strides = array<i32>} : memref<8x16xf32, #tpu.memory_space<vmem>>, vector<1x16xf32>,
      %c0_15 = arith.constant 0 : index
      %c0_16 = arith.constant 0 : index
      %32 = vector.load %arg8[%c0_15, %c0_16] : memref<16x16xf32, #tpu.memory_space<vmem>>, vector<16x16xf32>
      %cst_17 = arith.constant dense<0.000000e+00> : vector<16x16xf32>
      %33 = tpu.matmul %26, %26, %cst_17 {dimension_numbers = #tpu.dot_dimension_numbers<[0], [0], [1], [1], [0, 1, 1, 1], [], []>} : vector<8x16xf32>, vector<8x16xf32>, vector<16x16xf32> -> vector<16x16xf32>
      %34 = arith.addf %32, %33 : vector<16x16xf32>
      %c0_18 = arith.constant 0 : index
      %c0_19 = arith.constant 0 : index
      %35 = vector.load %arg8[%c0_18, %c0_19] : memref<16x16xf32, #tpu.memory_space<vmem>>, vector<16x16xf32>
      tpu.vector_store %arg8[%c0_18, %c0_19], %34 {strides = array<i32>} : memref<16x16xf32, #tpu.memory_space<vmem>>, vector<16x16xf32>,
    } else {
    }
    %c0_i32_4 = arith.constant 0 : i32
    %8 = arith.cmpi eq, %arg0, %c0_i32_4 : i32
    %c0_i32_5 = arith.constant 0 : i32
    %9 = arith.cmpi eq, %arg1, %c0_i32_5 : i32
    %10 = arith.andi %8, %9 : i1
    %11 = arith.extui %10 : i1 to i32
    %c0_i32_6 = arith.constant 0 : i32
    %12 = arith.cmpi ne, %11, %c0_i32_6 : i32
    scf.if %12 {
      %c0 = arith.constant 0 : index
      %c0_8 = arith.constant 0 : index
      %16 = vector.load %arg3[%c0, %c0_8] : memref<16x32xf32, #tpu.memory_space<vmem>>, vector<16x32xf32>
      %c0_9 = arith.constant 0 : index
      %c0_10 = arith.constant 0 : index
      %17 = vector.load %arg7[%c0_9, %c0_10] : memref<8x16xf32, #tpu.memory_space<vmem>>, vector<8x16xf32>
      %cst = arith.constant dense<0.000000e+00> : vector<8x32xf32>
      %18 = tpu.matmul %17, %16, %cst {dimension_numbers = #tpu.dot_dimension_numbers<[1], [0], [0], [1], [0, 0, 1, 1], [], []>} : vector<8x16xf32>, vector<16x32xf32>, vector<8x32xf32> -> vector<8x32xf32>
      %19 = vector.extract_strided_slice %18 {offsets = [0, 0], sizes = [1, 32], strides = [1, 1]} : vector<8x32xf32> to vector<1x32xf32>
      %cst_11 = arith.constant 1.250000e-01 : f32
      %20 = vector.broadcast %cst_11 : f32 to vector<1x32xf32>
      %21 = arith.mulf %19, %20 : vector<1x32xf32>
      %c0_12 = arith.constant 0 : index
      %c0_13 = arith.constant 0 : index
      %22 = vector.load %arg8[%c0_12, %c0_13] : memref<16x16xf32, #tpu.memory_space<vmem>>, vector<16x16xf32>
      %cst_14 = arith.constant dense<0.000000e+00> : vector<16x32xf32>
      %23 = tpu.matmul %22, %16, %cst_14 {dimension_numbers = #tpu.dot_dimension_numbers<[1], [0], [0], [1], [0, 0, 1, 1], [], []>} : vector<16x16xf32>, vector<16x32xf32>, vector<16x32xf32> -> vector<16x32xf32>
      %24 = arith.mulf %16, %23 : vector<16x32xf32>
      %cst_15 = arith.constant dense<0.000000e+00> : vector<32xf32>
      %25 = vector.multi_reduction <add>, %24, %cst_15 [0] : vector<16x32xf32> to vector<32xf32>
      %26 = vector.shape_cast %25 : vector<32xf32> to vector<1x32xf32>
      %cst_16 = arith.constant 1.250000e-01 : f32
      %27 = vector.broadcast %cst_16 : f32 to vector<1x32xf32>
      %28 = arith.mulf %26, %27 : vector<1x32xf32>
      %29 = arith.mulf %21, %21 : vector<1x32xf32>
      %30 = arith.subf %28, %29 : vector<1x32xf32>
      %cst_17 = arith.constant 0.000000e+00 : f32
      %31 = vector.broadcast %cst_17 : f32 to vector<1x32xf32>
      %32 = arith.maximumf %30, %31 : vector<1x32xf32>
      %c0_18 = arith.constant 0 : index
      %c0_19 = arith.constant 0 : index
      %33 = vector.load %arg4[%c0_18, %c0_19] : memref<1x32xf32, #tpu.memory_space<vmem>>, vector<1x32xf32>
      %cst_20 = arith.constant 9.99999993E-9 : f32
      %34 = vector.broadcast %cst_20 : f32 to vector<1x32xf32>
      %35 = arith.addf %32, %34 : vector<1x32xf32>
      %36 = math.rsqrt %35 : vector<1x32xf32>
      %37 = arith.mulf %33, %36 : vector<1x32xf32>
      %c0_21 = arith.constant 0 : index
      %c0_22 = arith.constant 0 : index
      %38 = vector.load %arg9[%c0_21, %c0_22] : memref<1x32xf32, #tpu.memory_space<vmem>>, vector<1x32xf32>
      tpu.vector_store %arg9[%c0_21, %c0_22], %37 {strides = array<i32>} : memref<1x32xf32, #tpu.memory_space<vmem>>, vector<1x32xf32>,
      %c0_23 = arith.constant 0 : index
      %c0_24 = arith.constant 0 : index
      %39 = vector.load %arg5[%c0_23, %c0_24] : memref<1x32xf32, #tpu.memory_space<vmem>>, vector<1x32xf32>
      %40 = arith.mulf %21, %37 : vector<1x32xf32>
      %41 = arith.subf %39, %40 : vector<1x32xf32>
      %c0_25 = arith.constant 0 : index
      %c0_26 = arith.constant 0 : index
      %42 = vector.load %arg10[%c0_25, %c0_26] : memref<1x32xf32, #tpu.memory_space<vmem>>, vector<1x32xf32>
      tpu.vector_store %arg10[%c0_25, %c0_26], %41 {strides = array<i32>} : memref<1x32xf32, #tpu.memory_space<vmem>>, vector<1x32xf32>,
    } else {
    }
    %c1_i32 = arith.constant 1 : i32
    %13 = arith.cmpi eq, %arg0, %c1_i32 : i32
    %14 = arith.extui %13 : i1 to i32
    %c0_i32_7 = arith.constant 0 : i32
    %15 = arith.cmpi ne, %14, %c0_i32_7 : i32
    scf.if %15 {
      %c0 = arith.constant 0 : index
      %c0_8 = arith.constant 0 : index
      %16 = vector.load %arg2[%c0, %c0_8] : memref<8x16xf32, #tpu.memory_space<vmem>>, vector<8x16xf32>
      %c0_9 = arith.constant 0 : index
      %c0_10 = arith.constant 0 : index
      %17 = vector.load %arg3[%c0_9, %c0_10] : memref<16x32xf32, #tpu.memory_space<vmem>>, vector<16x32xf32>
      %cst = arith.constant dense<0.000000e+00> : vector<8x32xf32>
      %18 = tpu.matmul %16, %17, %cst {dimension_numbers = #tpu.dot_dimension_numbers<[1], [0], [0], [1], [0, 0, 1, 1], [], []>} : vector<8x16xf32>, vector<16x32xf32>, vector<8x32xf32> -> vector<8x32xf32>
      %c0_11 = arith.constant 0 : index
      %c0_12 = arith.constant 0 : index
      %19 = vector.load %arg9[%c0_11, %c0_12] : memref<1x32xf32, #tpu.memory_space<vmem>>, vector<1x32xf32>
      %20 = vector.broadcast %19 : vector<1x32xf32> to vector<8x32xf32>
      %21 = arith.mulf %18, %20 : vector<8x32xf32>
      %c0_13 = arith.constant 0 : index
      %c0_14 = arith.constant 0 : index
      %22 = vector.load %arg10[%c0_13, %c0_14] : memref<1x32xf32, #tpu.memory_space<vmem>>, vector<1x32xf32>
      %23 = vector.broadcast %22 : vector<1x32xf32> to vector<8x32xf32>
      %24 = arith.addf %21, %23 : vector<8x32xf32>
      %cst_15 = arith.constant 0.00999999977 : f32
      %25 = vector.broadcast %cst_15 : f32 to vector<8x32xf32>
      %26 = arith.mulf %25, %24 : vector<8x32xf32>
      %27 = arith.maximumf %24, %26 : vector<8x32xf32>
      %c0_16 = arith.constant 0 : index
      %c0_17 = arith.constant 0 : index
      %28 = vector.load %arg6[%c0_16, %c0_17] : memref<8x32xf32, #tpu.memory_space<vmem>>, vector<8x32xf32>
      tpu.vector_store %arg6[%c0_16, %c0_17], %27 {strides = array<i32>} : memref<8x32xf32, #tpu.memory_space<vmem>>, vector<8x32xf32>,
    } else {
    }
    return
  }
  func.func @transform_0(%arg0: i32, %arg1: i32) -> (i32, i32) {
    %c0_i32 = arith.constant 0 : i32
    %c0_i32_0 = arith.constant 0 : i32
    return %arg1, %c0_i32 : i32, i32
  }
  func.func @transform_1(%arg0: i32, %arg1: i32) -> (i32, i32) {
    %c0_i32 = arith.constant 0 : i32
    %c0_i32_0 = arith.constant 0 : i32
    %c0_i32_1 = arith.constant 0 : i32
    return %c0_i32, %c0_i32_0 : i32, i32
  }
  func.func @transform_2(%arg0: i32, %arg1: i32) -> (i32, i32) {
    %c0_i32 = arith.constant 0 : i32
    %c0_i32_0 = arith.constant 0 : i32
    %c0_i32_1 = arith.constant 0 : i32
    return %c0_i32, %c0_i32_0 : i32, i32
  }
  func.func @transform_3(%arg0: i32, %arg1: i32) -> (i32, i32) {
    %c0_i32 = arith.constant 0 : i32
    %c0_i32_0 = arith.constant 0 : i32
    %c0_i32_1 = arith.constant 0 : i32
    return %c0_i32, %c0_i32_0 : i32, i32
  }
  func.func @transform_4(%arg0: i32, %arg1: i32) -> (i32, i32) {
    %0 = arith.muli %arg1, %arg0 : i32
    %c0_i32 = arith.constant 0 : i32
    %c0_i32_0 = arith.constant 0 : i32
    return %0, %c0_i32 : i32, i32
  }
}

</mosaic_0001>

<bundles_post_ra>
// kernel: tpu_custom_call.1
= control target key start
LH: loop header
LB: loop body
LE: loop exit
PB: predicated region body
PF: predicated region fallthrough
CT: control target
= control target key end

     0   :  { %9 = vsyncpa [#allocation7], 0  ;;  %s1213_s0 = inlined_call_operand.hbm [shape: f32[8,16], index: 0, kind: input, shape index: {}]   ;;  %s1214_s1 = inlined_call_operand.hbm [shape: f32[16,32], index: 1, kind: input, shape index: {}]   ;;  %s1215_s2 = inlined_call_operand.vmem [shape: f32[1,32], index: 2, kind: input, shape index: {}]   ;;  %s1216_s3 = inlined_call_operand.vmem [shape: f32[1,32], index: 3, kind: input, shape index: {}]   ;;  %s1217_s4 = inlined_call_operand.hbm [shape: f32[8,32], index: 4, kind: output, shape index: {}]  }
   0x1   :  { %10 = vsyncpa [#allocation10], 0 }
   0x2   :  { %11 = vsyncpa [#allocation8], 0 }
   0x3   :  { %13 = vsyncpa [#allocation8 + $0x1], 0  ;;  %s1062_s15 = smov 0   ;;  %s1064_s16 = smov 0  }
   0x4   :  { %s1066_s17 = smov 0  }
   0x5 LB: > { %s765_s18 = sadd.s32 4294967295, %s1023_s17   ;;  %s766_s19 = sadd.s32 4294967294, %s1023_s17   ;;  %s1023_s17 = sphi %s1066_s17, %s19_s17   ;;  %s1019_s16 = sphi %s1064_s16, %s1228_s16   ;;  %s1015_s15 = sphi %s1062_s15, %s1227_s15  }
   0x6   : > { %s31_s20 = sadd.s32 1, %s1019_s16  ;;  %p767_p0 = scmp.ge.s32.totalorder %s1023_s17, 1 }
   0x7   : > { %p33_p1 = scmp.ge.s32.totalorder %s31_s20, 2  ;;  %p153_p2 = scmp.lt.s32.totalorder %s1023_s17, 3 }
   0x8   : > { %p1084_p3 = scmp.eq.s32.totalorder %s765_s18, 0  ;;  %s1025_s23 = smov [#allocation6]  }
   0x9   : > { %s1230_s20 = smov (%p33_p1, %s31_s20), 0  ;;  %p1090_p4 = pnand %p767_p0, %p153_p2 }
   0xa   : > { %s1221_s21 = scalar_select %p1084_p3, 1, 0 }
   0xb   : > { %s1222_s22 = scalar_select %p1090_p4, 1, 0 }
   0xc   : > { %s168_s24 = sshll.u32 %s1025_s23, 4  ;;  %p850_p5 = pneg %p1090_p4  ;;  %s169_s24 = int_to_ptr.vmem [resolvable:$true] %s168_s24 }
   0xd   : > { %s1026_s25 = smov [#allocation9]   ;;  %s907_s30 = scalar_lea.hbm %s1213_s0, 128 }
   0xe   : > { %s178_s26 = sshll.u32 %s1026_s25, 4  ;;  %p1098_p6 = pnand %p1084_p3, %p850_p5  ;;  %s1102_s26 = int_to_ptr.vmem [resolvable:$true] %s178_s26 }
   0xf   : > { %p908_p7 = scmp.ne.s32.totalorder %s1213_s0, %s907_s30  ;;  %p914_p11 = scmp.lt.u32.totalorder %s907_s30, %s1213_s0 }
  0x10   : > { %p909_p8 = pneg %p1098_p6 }
  0x12   : > { %p910_p9 = pnand %p909_p8, %p908_p7 }
  0x14   : > { %p911_p10 = pneg %p910_p9 }
  0x16   : > { %p916_p12 = pnand %p914_p11, %p911_p10 }
  0x18   : > { %919 = shalt.err (!%p916_p12)
}
  0x19   : > { %s920_s9 = scalar_lea.vmem %s169_s24, 128  ;;  %p928_p2 = scmp.lt.s32.totalorder %s169_s24, %s169_s24 }
  0x1a   : > { %p921_p13 = scmp.ne.s32.totalorder %s169_s24, %s920_s9  ;;  %p929_p5 = scmp.lt.s32.totalorder %s920_s9, %s920_s9 }
  0x1c   : > { %p923_p0 = pnand %p921_p13, %p909_p8  ;;  %p930_p3 = por %p929_p5, %p928_p2 }
  0x1e   : > { %p924_p1 = pneg %p923_p0 }
  0x20   : > { %p931_p4 = pnand %p930_p3, %p924_p1 }
  0x22   : > { %934 = shalt.err (!%p931_p4)
}
  0x23   : > { %853 = dma.hbm_to_vmem [thread:$0]  (!%p1098_p6), %s1213_s0, 128, %s169_s24, [#allocation7]  }
  0x24   : > { %s935_s14 = scalar_lea.hbm %s1214_s1, 256 }
  0x25   : > { %p936_p7 = scmp.ne.s32.totalorder %s1214_s1, %s935_s14  ;;  %p942_p4 = scmp.lt.u32.totalorder %s935_s14, %s1214_s1 }
  0x27   : > { %p938_p9 = pnand %p936_p7, %p909_p8 }
  0x29   : > { %p939_p3 = pneg %p938_p9 }
  0x2b   : > { %p944_p10 = pnand %p942_p4, %p939_p3 }
  0x2d   : > { %947 = shalt.err (!%p944_p10)
}
  0x2e   : > { %s948_s24 = scalar_lea.vmem %s1102_s26, 256  ;;  %p956_p0 = scmp.lt.s32.totalorder %s1102_s26, %s1102_s26 }
  0x2f   : > { %p949_p11 = scmp.ne.s32.totalorder %s1102_s26, %s948_s24  ;;  %p957_p1 = scmp.lt.s32.totalorder %s948_s24, %s948_s24 }
  0x31   : > { %p951_p12 = pnand %p949_p11, %p909_p8  ;;  %p958_p2 = por %p957_p1, %p956_p0 }
  0x33   : > { %p952_p13 = pneg %p951_p12 }
  0x35   : > { %p959_p5 = pnand %p958_p2, %p952_p13 }
  0x37   : > { %962 = shalt.err (!%p959_p5)
}
  0x38   : > { %s1027_s30 = smov 128   ;;  %s1028_s5 = smov 8  }
  0x39   : > { %856 = dma.hbm_to_vmem [thread:$0]  (!%p1098_p6), %s1214_s1, 256, %s1102_s26, [#allocation10], %s1027_s30, %s1027_s30, %s1028_s5  }
  0x3a   : > { %p1224_p7 = scmp.ne.s32.totalorder %s1222_s22, 0 }
  0x3b   : > { %p1225_p8 = scmp.ne.s32.totalorder (!%p1224_p7), %s1221_s21, 0 }
  0x3c   : > { %200 = sbr.rel (%p1224_p7) target bundleno = 945 (0x3b1), region = 36 }
  0x43   : > { %1002 = dma.done.wait (%p1225_p8), [#allocation7], 128  }
  0x44   : > { %1004 = vsyncadd (%p1225_p8), [#allocation7], 4294967168 }
  0x45   : > { %1006 = dma.done.wait (%p1225_p8), [#allocation10], 256  }
  0x46   : > { %1008 = vsyncadd (%p1225_p8), [#allocation10], 4294967040  ;;  %p226_p9 = scmp.eq.s32.totalorder %s1015_s15, 0 }
  0x47   : > { %vm232_vm0 = vcmask (%p226_p9), 130048   ;;  %v1029_v0 = vmov (%p226_p9), 0.0  }
  0x48   : > { %231 = sbr.rel (!%p226_p9) target bundleno = 79 (0x4f), region = 48  ;;  %233 = vst.msk [vmem:[#allocation2] sm:$0xff] (%p226_p9), %vm232_vm0, %v1029_v0  ;;  %234 = vst.msk [vmem:[#allocation3] sm:$0xff] (%p226_p9), %vm232_vm0, %v1029_v0 }
  0x49   : > { %235 = vst.msk [vmem:[#allocation3 + $0x8] sm:$0xff] (%p226_p9), %vm232_vm0, %v1029_v0 }
  0x4f PF: > { %p774_p6 = scmp.ne.s32.totalorder %s1015_s15, 0 }
  0x50   : > { %v239_v1 = vld [vmem:[#allocation6] sm:$0xff] (!%p774_p6)  ;;  %vm250_vm1 = vcmask (!%p774_p6), 130048   ;;  %vm259_vm2 = vcmask (!%p774_p6), 122880   ;;  %vm295_vm3 = vcmask (!%p774_p6), 64512   ;;  %v262_v13 = vld [vmem:[#allocation3 + $0x8] sm:$0xff] (!%p774_p6)  ;;  %v261_v14 = vld [vmem:[#allocation3] sm:$0xff] (!%p774_p6) }
  0x51   : > { %238 = sbr.rel (%p774_p6) target bundleno = 430 (0x1ae), region = 52  ;;  %263 = vxpose.xlu0.b32.start.end [1/1] (short) (narrow) (!%p774_p6), %v239_v1, 16  ;;  %802 = vmatprep.subr.mxu0 (!%p774_p6), %v239_v1  ;;  %v251_v2 = vsel (!%p774_p6), %vm250_vm1, %v239_v1, 0.0  ;;  %v249_v8 = vld [vmem:[#allocation2] sm:$0x1] (!%p774_p6) }
  0x52   : > { %803 = vmatpush3.msra.mxu0 (!%p774_p6), %v239_v1  ;;  %v252_v3 = vrot.slane (!%p774_p6), %v251_v2, 4 }
  0x54   : > { %v253_v4 = vadd.f32 (!%p774_p6), %v252_v3, %v251_v2 }
  0x56   : > { %v254_v5 = vrot.slane (!%p774_p6), %v253_v4, 2 }
  0x58   : > { %v255_v6 = vadd.f32 %v254_v5, %v253_v4 }
  0x5a   : > { %v256_v7 = vrot.slane %v255_v6, 1 }
  0x5c   : > { %v257_v9 = vadd.f32 %v256_v7, %v255_v6 }
  0x5e   : > { %v258_v10 = vadd.f32 %v257_v9, %v249_v8 }
  0x60   : > { %260 = vst.msk [vmem:[#allocation2] sm:$0x1] %vm259_vm2, %v258_v10 }
  0xd1   : > { %v279_v11 = vpop.trf.xlu0 }
  0xd2   : > { %804 = vmatprep.mubr.msk.f32.mxu0 %vm295_vm3, %v279_v11 }
  0xd5   : > { %v280_v12 = vpop.trf.xlu0 }
  0xd6   : > { %805 = vmatmul.mubr.msk.f32.vlgmr.msra.gmra.mrb[0].mxu0 %vm295_vm3, %v280_v12 }
 0x1a9   : > { %v806_v15 = vpop.f32.mrb[0].mxu0 }
 0x1aa   : > { %v378_v16 = vadd.f32 %v806_v15, %v262_v13  ;;  %v368_v17 = vpop.f32.mrb[1].mxu0 }
 0x1ab   : > { %v377_v18 = vadd.f32 %v368_v17, %v261_v14 }
 0x1ac   : > { %380 = vst.msk [vmem:[#allocation3 + $0x8] sm:$0xff] %vm250_vm1, %v378_v16 }
 0x1ad   : > { %379 = vst.msk [vmem:[#allocation3] sm:$0xff] %vm250_vm1, %v377_v18 }
 0x1ae PF: > { %382 = sbr.rel (!%p226_p9) target bundleno = 694 (0x2b6), region = 56  ;;  %v383_v19 = vld [vmem:[#allocation9] sm:$0xff] (%p226_p9)  ;;  %v384_v20 = vld [vmem:[#allocation9 + $0x8] sm:$0xff] (%p226_p9)  ;;  %vm386_vm4 = vcmask (%p226_p9), 130048   ;;  %v1030_v23 = vmov (%p226_p9), 0.0|0.0   ;;  %vm1031_vm5 = vmmov (%p226_p9), 0  }
 0x1af   : > { %v829_v22 = vpack.c.bf16 (%p226_p9), %v384_v20, %v383_v19  ;;  %828 = vmatprep.subr.bf16.mxu0 (%p226_p9), %v1030_v23  ;;  %v1032_v24 = vmov (%p226_p9), 0.0   ;;  %v385_v25 = vld [vmem:[#allocation2] sm:$0xff] (%p226_p9)  ;;  %vm546_vm6 = vcmask (%p226_p9), 261120   ;;  %vm564_vm7 = vcmask (%p226_p9), 253952  }
 0x1b0   : > { %811 = vmatprep.mubr.msk.f32.mxu0 (%p226_p9), %vm1031_vm5, %v1032_v24  ;;  %v560_v48 = vld [vmem:[%s1215_s2] sm:$0x1] (%p226_p9) }
 0x1b1   : > { %832 = vmatprep.subr.bf16.mxu1 (%p226_p9), %v829_v22  ;;  %830 = vmatpush3.bf16.msra.mxu0 (%p226_p9), %v829_v22  ;;  %v566_v51 = vld [vmem:[%s1216_s3] sm:$0x1] (%p226_p9) }
 0x1b2   : > { %834 = vmatpush3.bf16.msra.mxu1 (%p226_p9), %v829_v22 }
 0x1b3   : > { %v462_v26 = vld [vmem:[#allocation3 + $0x8] sm:$0xff] (%p226_p9) }
 0x1b4   : > { %v461_v21 = vld [vmem:[#allocation3] sm:$0xff] (%p226_p9)  ;;  %812 = vmatmul.mubr.msk.f32.vlgmr.msra.gmra.mrb[0].mxu0 (%p226_p9), %vm386_vm4, %v385_v25 }
 0x1b5   : > { %818 = vmatprep.mubr.msk.f32.mxu1 %vm386_vm4, %v461_v21 }
 0x1b6   : > { %819 = vmatmul.mubr.msk.f32.vlgmr.msra.gmra.mrb[0].mxu1 %vm386_vm4, %v462_v26 }
 0x287   : > { %v456_v27 = vpop.f32.mrb[0].mxu0 }
 0x288   : > { %v813_v29 = vpop.f32.mrb[1].mxu0  ;;  %v460_v40 = vmul.f32 0.125, %v456_v27 }
 0x289   : > { %v820_v28 = vpop.f32.mrb[0].mxu1 }
 0x28a   : > { %v545_v30 = vmul.f32 %v820_v28, %v384_v20  ;;  %v535_v31 = vpop.f32.mrb[1].mxu1  ;;  %v557_v43 = vmul.f32 %v460_v40, %v460_v40 }
 0x28b   : > { %v544_v32 = vmul.f32 %v535_v31, %v383_v19 }
 0x28c   : > { %v548_v33 = vsel %vm546_vm6, %v545_v30, 0.0 }
 0x28d   : > { %v547_v34 = vsel %vm546_vm6, %v544_v32, 0.0 }
 0x28e   : > { %v549_v35 = vadd.f32 %v548_v33, %v547_v34 }
 0x290   : > { %v550_v36 = vrot.slane %v549_v35, 4 }
 0x292   : > { %v551_v37 = vadd.f32 %v550_v36, %v549_v35 }
 0x294   : > { %v552_v38 = vrot.slane %v551_v37, 2 }
 0x296   : > { %v553_v39 = vadd.f32 %v552_v38, %v551_v37 }
 0x298   : > { %v554_v41 = vrot.slane %v553_v39, 1 }
 0x29a   : > { %v555_v42 = vadd.f32 %v554_v41, %v553_v39 }
 0x29c   : > { %v556_v44 = vmul.f32 0.125, %v555_v42 }
 0x29e   : > { %v558_v45 = vsub.f32 %v556_v44, %v557_v43 }
 0x2a0   : > { %v559_v46 = vmax.f32 %v558_v45, 0.0 }
 0x2a2   : > { %v561_v47 = vadd.f32 1e-08, %v559_v46 }
 0x2a4   : > { %905 = vrsqrt.f32 %v561_v47 }
 0x2ae   : > { %v906_v49 = vpop.eup %905 }
 0x2af   : > { %v563_v50 = vmul.f32 %v906_v49, %v560_v48 }
 0x2b1   : > { %565 = vst.msk [vmem:[#allocation4] sm:$0x1] %vm564_vm7, %v563_v50  ;;  %v567_v52 = vmul.f32 %v563_v50, %v460_v40 }
 0x2b3   : > { %v568_v53 = vsub.f32 %v566_v51, %v567_v52 }
 0x2b5   : > { %569 = vst.msk [vmem:[#allocation5] sm:$0x1] %vm564_vm7, %v568_v53 }
 0x2b6 PF: > { %p780_p3 = scmp.ne.s32.totalorder %s1015_s15, 1 }
 0x2b7   : > { %v575_v54 = vld [vmem:[#allocation9] sm:$0xff] (!%p780_p3)  ;;  %v576_v55 = vld [vmem:[#allocation9 + $0x8] sm:$0xff] (!%p780_p3)  ;;  %v1033_v56 = vmov (!%p780_p3), 0.0|0.0   ;;  %vm1034_vm8 = vmmov (!%p780_p3), 0   ;;  %v1035_v58 = vmov (!%p780_p3), 0.0   ;;  %v574_v59 = vld [vmem:[#allocation6] sm:$0xff] (!%p780_p3) }
 0x2b8   : > { %573 = sbr.rel (%p780_p3) target bundleno = 922 (0x39a), region = 60  ;;  %835 = vmatprep.subr.bf16.mxu0 (!%p780_p3), %v1033_v56  ;;  %v836_v57 = vpack.c.bf16 (!%p780_p3), %v576_v55, %v575_v54  ;;  %825 = vmatprep.mubr.msk.f32.mxu0 (!%p780_p3), %vm1034_vm8, %v1035_v58  ;;  %vm577_vm9 = vcmask (!%p780_p3), 130048   ;;  %v782_v60 = vld [vmem:[#allocation4] ss:$0 sm:$0xff] (!%p780_p3)  ;;  %vm669_vm10 = vcmask (!%p780_p3), 261120  }
 0x2ba   : > { %837 = vmatpush3.bf16.msra.mxu0 (!%p780_p3), %v836_v57 }
 0x2bc   : > { %v783_v62 = vld [vmem:[#allocation5] ss:$0 sm:$0xff] (!%p780_p3) }
 0x2bd   : > { %826 = vmatmul.mubr.msk.f32.vlgmr.msra.gmra.mrb[0].mxu0 (!%p780_p3), %vm577_vm9, %v574_v59 }
 0x390   : > { %v647_v61 = vpop.f32.mrb[0].mxu0 }
 0x391   : > { %v658_v63 = vmul.f32 %v782_v60, %v647_v61  ;;  %v827_v0 = vpop.f32.mrb[1].mxu0 }
 0x393   : > { %v666_v1 = vadd.f32 %v783_v62, %v658_v63 }
 0x395   : > { %v667_v2 = vmul.f32 0.01, %v666_v1 }
 0x397   : > { %v668_v3 = vmax.f32 %v666_v1, %v667_v2 }
 0x399   : > { %670 = vst.msk [vmem:[#allocation11] sm:$0xff] %vm669_vm10, %v668_v3 }
 0x39a PF: > { %p1179_p4 = scmp.eq.s32.totalorder %s765_s18, 1  ;;  %s1036_s8 = smov [#allocation11]  }
 0x39b   : > { %s686_s9 = sshll.u32 %s1036_s8, 4  ;;  %s687_s9 = int_to_ptr.vmem [resolvable:$true] %s686_s9 }
 0x39c   : > { %s963_s10 = scalar_lea.vmem %s687_s9, 128  ;;  %s969_s11 = scalar_lea.vmem %s687_s9, 256 }
 0x39d   : > { %p964_p10 = scmp.ne.s32.totalorder %s687_s9, %s963_s10  ;;  %p970_p13 = scmp.lt.s32.totalorder %s687_s9, %s687_s9 }
 0x39e   : > { %p971_p0 = scmp.lt.s32.totalorder %s969_s11, %s963_s10 }
 0x39f   : > { %p965_p11 = pnand %p964_p10, %p1179_p4 }
 0x3a0   : > { %p972_p1 = por %p971_p0, %p970_p13 }
 0x3a1   : > { %p966_p12 = pneg %p965_p11 }
 0x3a3   : > { %p973_p2 = pnand %p972_p1, %p966_p12 }
 0x3a5   : > { %976 = shalt.err (!%p973_p2)
}
 0x3a6   : > { %s977_s13 = scalar_lea.hbm %s1217_s4, 128 }
 0x3a7   : > { %p978_p5 = scmp.ne.s32.totalorder %s1217_s4, %s977_s13  ;;  %p983_p9 = scmp.lt.u32.totalorder %s977_s13, %s1217_s4 }
 0x3a9   : > { %p979_p7 = pnand %p978_p5, %p1179_p4 }
 0x3ab   : > { %p980_p8 = pneg %p979_p7 }
 0x3ad   : > { %p985_p6 = pnand %p983_p9, %p980_p8 }
 0x3af   : > { %988 = shalt.err (!%p985_p6)
}
 0x3b0   : > { %847 = dma.vmem_to_hbm [thread:$0]  (%p1179_p4), %s687_s9, 128, %s1217_s4, [#allocation8]  }
 0x3b1 PF: > { %p866_p3 = scmp.ge.s32.totalorder %s1023_s17, 2  ;;  %p867_p10 = scmp.eq.s32.totalorder %s766_s19, 1 }
 0x3b3   : > { %p858_p11 = pnand %p867_p10, %p866_p3 }
 0x3b5   : > { %1010 = dma.done.wait (!%p858_p11), [#allocation8], 128  }
 0x3b6   : > { %1012 = vsyncadd (!%p858_p11), [#allocation8], 4294967168  ;;  %s19_s17 = sadd.s32 1, %s1023_s17   ;;  %s1227_s15 = smov %s1019_s16 }
 0x3b7   : > { %p16_p12 = scmp.ge.s32.totalorder %s19_s17, 4   ;;  %s1228_s16 = smov %s1230_s20 }
 0x3b9   :  { %18 = sbr.rel (!%p16_p12) target bundleno = 5 (0x5), region = 94 }
 0x3c0   :  { %704 = vsyncpa [#allocation7], 1 }
 0x3c1   :  { %706 = vsyncpa [#allocation7 + $0x1], 1 }
 0x3c2   :  { %707 = vsyncpa [#allocation10], 1 }
 0x3c3   :  { %708 = vsyncpa [#allocation8], 1 }
 0x3c4   :  { %710 = vsyncpa [#allocation8 + $0x1], 1 }

</bundles_post_ra>
